<compile_context>
chip_gen: v7x
topology: tpu7x:2x2x1
jax: 0.10.0
libtpu: 0.0.40
codegen_flags: <defaults>
</compile_context>

<pallas_src>
import functools

import jax
import jax.numpy as jnp
from jax.experimental import pallas as pl
from jax.experimental.pallas import tpu as pltpu

EPS = 1e-5
NEG_SLOPE = 0.01
DROP_P = 0.2
LANE = 128


def _round_up(n, m):
    return ((n + m - 1) // m) * m


def _pad2(a, rows, cols):
    r, c = a.shape
    return jnp.pad(a, ((0, rows - r), (0, cols - c)))


# ---------------------------------------------------------------------------
# In-kernel helpers
# ---------------------------------------------------------------------------
def _leaky(h):
    return jnp.where(h > 0, h, NEG_SLOPE * h)


def _bn_train(h, gamma, beta, inv_n):
    # One pass over h: sum + sum-of-squares, then a fused per-feature scale/shift.
    s = jnp.sum(h, axis=0, keepdims=True)
    sq = jnp.sum(h * h, axis=0, keepdims=True)
    mean = s * inv_n
    var = sq * inv_n - mean * mean          # biased variance (PyTorch train-mode)
    scale = gamma * jax.lax.rsqrt(var + EPS)
    shift = beta - mean * scale
    return h * scale + shift


def _dot_bf16(a, w_bf16):
    # bf16 operands, f32 accumulation on the MXU.
    return jnp.dot(a.astype(jnp.bfloat16), w_bf16, preferred_element_type=jnp.float32)


# ---------------------------------------------------------------------------
# Kernels
# ---------------------------------------------------------------------------
def _mlp_train_kernel(x_ref, w1_ref, w2_ref, w3_ref, vecs_ref, b3_ref,
                      m1_ref, m2_ref, out_ref, *, inv_n):
    x = x_ref[...]

    g1 = vecs_ref[0:1, :]
    be1 = vecs_ref[1:2, :]
    g2 = vecs_ref[2:3, :]
    be2 = vecs_ref[3:4, :]

    # block 1: Linear (bias cancelled by BN mean-subtraction) -> BN(train)
    #          -> Dropout -> LeakyReLU
    h = _dot_bf16(x, w1_ref[...])
    h = _bn_train(h, g1, be1, inv_n)
    h = _leaky(h * m1_ref[...].astype(jnp.float32))   # mask pre-scaled by 1/(1-p)

    # block 2
    h = _dot_bf16(h, w2_ref[...])
    h = _bn_train(h, g2, be2, inv_n)
    h = _leaky(h * m2_ref[...].astype(jnp.float32))

    # head: Linear (lane-dense padded output)
    out_ref[...] = (_dot_bf16(h, w3_ref[...]) + b3_ref[...]).astype(out_ref.dtype)


def _mlp_eval_kernel(x_ref, w1_ref, w2_ref, w3_ref, bvec_ref, b3_ref, out_ref):
    # BN(eval, init running stats) folded into w/b; Dropout is identity.
    b1 = bvec_ref[0:1, :]
    b2 = bvec_ref[1:2, :]
    h = _leaky(_dot_bf16(x_ref[...], w1_ref[...]) + b1)
    h = _leaky(_dot_bf16(h, w2_ref[...]) + b2)
    out_ref[...] = (_dot_bf16(h, w3_ref[...]) + b3_ref[...]).astype(out_ref.dtype)


# ---------------------------------------------------------------------------
# One-time parameter preparation (hoisted out of the hot path)
# ---------------------------------------------------------------------------
def _dims(params):
    w1, w3 = params[0], params[8]
    input_size, hidden = w1.shape
    num_classes = w3.shape[1]
    return (input_size, hidden, num_classes,
            _round_up(input_size, LANE), _round_up(hidden, LANE),
            _round_up(num_classes, LANE))


def prepare_train_params(params):
    (w1, _b1, g1, be1, w2, _b2, g2, be2, w3, b3) = params
    input_size, hidden, num_classes, in_p, h_p, c_p = _dims(params)

    w1p = _pad2(w1, in_p, h_p).astype(jnp.bfloat16)
    w2p = _pad2(w2, h_p, h_p).astype(jnp.bfloat16)
    w3p = _pad2(w3, h_p, c_p).astype(jnp.bfloat16)

    # Pack gamma/beta row-vectors into one sublane-dense (8, h_p) tile.
    vecs = jnp.zeros((8, h_p), jnp.float32)
    vecs = vecs.at[0, :hidden].set(g1[0])
    vecs = vecs.at[1, :hidden].set(be1[0])
    vecs = vecs.at[2, :hidden].set(g2[0])
    vecs = vecs.at[3, :hidden].set(be2[0])

    b3p = _pad2(b3, 1, c_p).astype(jnp.float32)
    return dict(w1=w1p, w2=w2p, w3=w3p, vecs=vecs, b3=b3p,
                dims=(input_size, hidden, num_classes, in_p, h_p, c_p))


def prepare_eval_params(params):
    (w1, b1, g1, be1, w2, b2, g2, be2, w3, b3) = params
    input_size, hidden, num_classes, in_p, h_p, c_p = _dims(params)

    # Fold BN-eval into the Linears.
    # TODO(synk): use actual running_mean/running_var if trained BN buffers are loaded.
    s1 = g1 * jax.lax.rsqrt(jnp.float32(1.0 + EPS))
    s2 = g2 * jax.lax.rsqrt(jnp.float32(1.0 + EPS))
    w1f, b1f = w1 * s1, b1 * s1 + be1
    w2f, b2f = w2 * s2, b2 * s2 + be2

    w1p = _pad2(w1f, in_p, h_p).astype(jnp.bfloat16)
    w2p = _pad2(w2f, h_p, h_p).astype(jnp.bfloat16)
    w3p = _pad2(w3, h_p, c_p).astype(jnp.bfloat16)

    bvec = jnp.zeros((8, h_p), jnp.float32)
    bvec = bvec.at[0, :hidden].set(b1f[0])
    bvec = bvec.at[1, :hidden].set(b2f[0])

    b3p = _pad2(b3, 1, c_p).astype(jnp.float32)
    return dict(w1=w1p, w2=w2p, w3=w3p, bvec=bvec, b3=b3p,
                dims=(input_size, hidden, num_classes, in_p, h_p, c_p))


def pad_input(x, prep):
    _, _, _, in_p, _, _ = prep["dims"]
    batch = x.shape[0]
    return _pad2(x.astype(jnp.float32), batch, in_p)


def make_dropout_masks(key, batch, h_p):
    """bf16 keep-masks, already scaled by 1/(1-p) (1.25 is exact in bf16)."""
    k1, k2 = jax.random.split(key)
    scale = jnp.bfloat16(1.0 / (1.0 - DROP_P))
    m1 = jax.random.bernoulli(k1, 1.0 - DROP_P, (batch, h_p)).astype(jnp.bfloat16) * scale
    m2 = jax.random.bernoulli(k2, 1.0 - DROP_P, (batch, h_p)).astype(jnp.bfloat16) * scale
    return m1, m2


# ---------------------------------------------------------------------------
# Forward: hot path is exactly one pallas_call
# ---------------------------------------------------------------------------
def _vmem_limit(args, out_bytes):
    nbytes = sum(int(a.size) * a.dtype.itemsize for a in args) + out_bytes
    # Whole-array no-grid call: budget buffers explicitly; clamp to v7x's 64 MiB.
    return int(min(64 * 1024 * 1024, max(16 * 1024 * 1024, 4 * nbytes)))


def mlp_forward_train(xp, m1, m2, prep):
    """xp: padded input (batch, in_p); returns padded output (batch, c_p)."""
    batch = xp.shape[0]
    _, _, _, _, _, c_p = prep["dims"]
    args = (xp, prep["w1"], prep["w2"], prep["w3"], prep["vecs"], prep["b3"], m1, m2)
    vmem = pl.BlockSpec(memory_space=pltpu.MemorySpace.VMEM)
    return pl.pallas_call(
        functools.partial(_mlp_train_kernel, inv_n=1.0 / batch),
        out_shape=jax.ShapeDtypeStruct((batch, c_p), jnp.float32),
        in_specs=[vmem] * len(args),
        out_specs=vmem,
        compiler_params=pltpu.CompilerParams(
            vmem_limit_bytes=_vmem_limit(args, batch * c_p * 4)),
    )(*args)


def mlp_forward_eval(xp, prep):
    batch = xp.shape[0]
    _, _, _, _, _, c_p = prep["dims"]
    args = (xp, prep["w1"], prep["w2"], prep["w3"], prep["bvec"], prep["b3"])
    vmem = pl.BlockSpec(memory_space=pltpu.MemorySpace.VMEM)
    return pl.pallas_call(
        _mlp_eval_kernel,
        out_shape=jax.ShapeDtypeStruct((batch, c_p), jnp.float32),
        in_specs=[vmem] * len(args),
        out_specs=vmem,
        compiler_params=pltpu.CompilerParams(
            vmem_limit_bytes=_vmem_limit(args, batch * c_p * 4)),
    )(*args)


# ---------------------------------------------------------------------------
# Params + pure-JAX references (PyTorch semantics, mirroring bf16 matmuls)
# ---------------------------------------------------------------------------
def init_params(key, input_size, hidden_size, num_classes):
    """PyTorch-Linear-style init: U(-1/sqrt(fan_in), 1/sqrt(fan_in)); BN gamma=1, beta=0."""
    keys = jax.random.split(key, 6)

    def linear(kw, kb, fan_in, fan_out):
        bound = 1.0 / jnp.sqrt(jnp.float32(fan_in))
        w = jax.random.uniform(kw, (fan_in, fan_out), jnp.float32, -bound, bound)
        b = jax.random.uniform(kb, (1, fan_out), jnp.float32, -bound, bound)
        return w, b

    w1, b1 = linear(keys[0], keys[1], input_size, hidden_size)
    w2, b2 = linear(keys[2], keys[3], hidden_size, hidden_size)
    w3, b3 = linear(keys[4], keys[5], hidden_size, num_classes)
    ones = jnp.ones((1, hidden_size), jnp.float32)
    zeros = jnp.zeros((1, hidden_size), jnp.float32)
    return (w1, b1, ones, zeros, w2, b2, ones, zeros, w3, b3)


def _ref_dot(a, w):
    return jnp.dot(a.astype(jnp.bfloat16), w.astype(jnp.bfloat16),
                   preferred_element_type=jnp.float32)


def _ref_bn_train(h, gamma, beta):
    mean = jnp.mean(h, axis=0, keepdims=True)
    var = jnp.mean((h - mean) ** 2, axis=0, keepdims=True)
    return (h - mean) * jax.lax.rsqrt(var + EPS) * gamma + beta


def reference_forward(x, params, *, masks=None, training=True):
    (w1, b1, g1, be1, w2, b2, g2, be2, w3, b3) = params
    hidden = w1.shape[1]
    if training:
        m1, m2 = masks
        h = _ref_dot(x, w1) + b1          # note: bias kept here (cancelled by BN)
        h = _leaky(_ref_bn_train(h, g1, be1) * m1[:, :hidden].astype(jnp.float32))
        h = _ref_dot(h, w2) + b2
        h = _leaky(_ref_bn_train(h, g2, be2) * m2[:, :hidden].astype(jnp.float32))
        return _ref_dot(h, w3) + b3
    else:
        s1 = g1 * jax.lax.rsqrt(jnp.float32(1.0 + EPS))
        s2 = g2 * jax.lax.rsqrt(jnp.float32(1.0 + EPS))
        h = _leaky(_ref_dot(x, w1 * s1) + (b1 * s1 + be1))
        h = _leaky(_ref_dot(h, w2 * s2) + (b2 * s2 + be2))
        return _ref_dot(h, w3) + b3


if __name__ == "__main__":
    input_size, hidden_size, num_classes = 32, 32, 10
    batch = 8   # multiple of 8 (f32 sublanes); BN stats are over the full batch

    key = jax.random.PRNGKey(0)
    k_x, k_p, k_d = jax.random.split(key, 3)
    x = jax.random.normal(k_x, (batch, input_size), jnp.float32)
    params = init_params(k_p, input_size, hidden_size, num_classes)

    # ---- one-time preparation (hoisted out of the hot path) ----
    prep_train = prepare_train_params(params)
    prep_eval = prepare_eval_params(params)
    xp = pad_input(x, prep_train)
    h_p = prep_train["dims"][4]
    masks = make_dropout_masks(k_d, batch, h_p)

    # ---- eval mode (dropout=identity, BN with init running stats) ----
    out_eval_p = jax.block_until_ready(mlp_forward_eval(xp, prep_eval))
    out_eval = out_eval_p[:, :num_classes]
    ref_eval = reference_forward(x, params, training=False)
    assert out_eval.shape == (batch, num_classes)
    assert jnp.allclose(out_eval, ref_eval, atol=2e-3, rtol=2e-3), "eval-mode mismatch"

    # ---- training mode (PyTorch default forward: batch-stat BN + dropout) ----
    out_train_p = jax.block_until_ready(mlp_forward_train(xp, masks[0], masks[1], prep_train))
    out_train = out_train_p[:, :num_classes]
    ref_train = reference_forward(x, params, masks=masks, training=True)
    assert out_train.shape == (batch, num_classes)
    assert bool(jnp.all(jnp.isfinite(out_train)))
    assert jnp.allclose(out_train, ref_train, atol=2e-3, rtol=2e-3), "train-mode mismatch"

    print("KERNEL_OK")
</pallas_src>

<mosaic_0001>
module attributes {stable_mosaic.version = 11 : i64} {
  func.func @_mlp_eval_kernel(%arg0: memref<8x128xf32, #tpu.memory_space<vmem>>, %arg1: memref<128x128xbf16, #tpu.memory_space<vmem>>, %arg2: memref<128x128xbf16, #tpu.memory_space<vmem>>, %arg3: memref<128x128xbf16, #tpu.memory_space<vmem>>, %arg4: memref<8x128xf32, #tpu.memory_space<vmem>>, %arg5: memref<1x128xf32, #tpu.memory_space<vmem>>, %arg6: memref<8x128xf32, #tpu.memory_space<vmem>>) attributes {dimension_semantics = [], scalar_prefetch = 0 : i64, scratch_operands = 0 : i64, tpu.core_type = #tpu.core_type<tc>} {
    %c0 = arith.constant 0 : index
    %c0_0 = arith.constant 0 : index
    %0 = vector.load %arg4[%c0, %c0_0] : memref<8x128xf32, #tpu.memory_space<vmem>>, vector<1x128xf32>
    %c1 = arith.constant 1 : index
    %c0_1 = arith.constant 0 : index
    %1 = vector.load %arg4[%c1, %c0_1] : memref<8x128xf32, #tpu.memory_space<vmem>>, vector<1x128xf32>
    %c0_2 = arith.constant 0 : index
    %c0_3 = arith.constant 0 : index
    %2 = vector.load %arg0[%c0_2, %c0_3] : memref<8x128xf32, #tpu.memory_space<vmem>>, vector<8x128xf32>
    %c0_4 = arith.constant 0 : index
    %c0_5 = arith.constant 0 : index
    %3 = vector.load %arg1[%c0_4, %c0_5] : memref<128x128xbf16, #tpu.memory_space<vmem>>, vector<128x128xbf16>
    %4 = arith.truncf %2 : vector<8x128xf32> to vector<8x128xbf16>
    %cst = arith.constant dense<0.000000e+00> : vector<8x128xf32>
    %5 = tpu.matmul %4, %3, %cst {dimension_numbers = #tpu.dot_dimension_numbers<[1], [0], [0], [1], [0, 0, 1, 1], [], []>} : vector<8x128xbf16>, vector<128x128xbf16>, vector<8x128xf32> -> vector<8x128xf32>
    %6 = vector.broadcast %0 : vector<1x128xf32> to vector<8x128xf32>
    %7 = arith.addf %5, %6 : vector<8x128xf32>
    %cst_6 = arith.constant 0.000000e+00 : f32
    %8 = vector.broadcast %cst_6 : f32 to vector<8x128xf32>
    %9 = arith.cmpf ogt, %7, %8 : vector<8x128xf32>
    %cst_7 = arith.constant 0.00999999977 : f32
    %10 = vector.broadcast %cst_7 : f32 to vector<8x128xf32>
    %11 = arith.mulf %10, %7 : vector<8x128xf32>
    %12 = arith.select %9, %7, %11 : vector<8x128xi1>, vector<8x128xf32>
    %c0_8 = arith.constant 0 : index
    %c0_9 = arith.constant 0 : index
    %13 = vector.load %arg2[%c0_8, %c0_9] : memref<128x128xbf16, #tpu.memory_space<vmem>>, vector<128x128xbf16>
    %14 = arith.truncf %12 : vector<8x128xf32> to vector<8x128xbf16>
    %cst_10 = arith.constant dense<0.000000e+00> : vector<8x128xf32>
    %15 = tpu.matmul %14, %13, %cst_10 {dimension_numbers = #tpu.dot_dimension_numbers<[1], [0], [0], [1], [0, 0, 1, 1], [], []>} : vector<8x128xbf16>, vector<128x128xbf16>, vector<8x128xf32> -> vector<8x128xf32>
    %16 = vector.broadcast %1 : vector<1x128xf32> to vector<8x128xf32>
    %17 = arith.addf %15, %16 : vector<8x128xf32>
    %cst_11 = arith.constant 0.000000e+00 : f32
    %18 = vector.broadcast %cst_11 : f32 to vector<8x128xf32>
    %19 = arith.cmpf ogt, %17, %18 : vector<8x128xf32>
    %cst_12 = arith.constant 0.00999999977 : f32
    %20 = vector.broadcast %cst_12 : f32 to vector<8x128xf32>
    %21 = arith.mulf %20, %17 : vector<8x128xf32>
    %22 = arith.select %19, %17, %21 : vector<8x128xi1>, vector<8x128xf32>
    %c0_13 = arith.constant 0 : index
    %c0_14 = arith.constant 0 : index
    %23 = vector.load %arg3[%c0_13, %c0_14] : memref<128x128xbf16, #tpu.memory_space<vmem>>, vector<128x128xbf16>
    %24 = arith.truncf %22 : vector<8x128xf32> to vector<8x128xbf16>
    %cst_15 = arith.constant dense<0.000000e+00> : vector<8x128xf32>
    %25 = tpu.matmul %24, %23, %cst_15 {dimension_numbers = #tpu.dot_dimension_numbers<[1], [0], [0], [1], [0, 0, 1, 1], [], []>} : vector<8x128xbf16>, vector<128x128xbf16>, vector<8x128xf32> -> vector<8x128xf32>
    %c0_16 = arith.constant 0 : index
    %c0_17 = arith.constant 0 : index
    %26 = vector.load %arg5[%c0_16, %c0_17] : memref<1x128xf32, #tpu.memory_space<vmem>>, vector<1x128xf32>
    %27 = vector.broadcast %26 : vector<1x128xf32> to vector<8x128xf32>
    %28 = arith.addf %25, %27 : vector<8x128xf32>
    %c0_18 = arith.constant 0 : index
    %c0_19 = arith.constant 0 : index
    %29 = vector.load %arg6[%c0_18, %c0_19] : memref<8x128xf32, #tpu.memory_space<vmem>>, vector<8x128xf32>
    tpu.vector_store %arg6[%c0_18, %c0_19], %28 {strides = array<i32>} : memref<8x128xf32, #tpu.memory_space<vmem>>, vector<8x128xf32>,
    return
  }
}

</mosaic_0001>

<bundles_post_ra>
// kernel: tpu_custom_call.1
= control target key start
LH: loop header
LB: loop body
LE: loop exit
PB: predicated region body
PF: predicated region fallthrough
CT: control target
= control target key end

     0   :  { %11 = vsyncpa [#allocation3], 0  ;;  %s852_s0 = inlined_call_operand.hbm [shape: f32[8,128], index: 0, kind: input, shape index: {}]   ;;  %s853_s1 = inlined_call_operand.hbm [shape: bf16[128,128], index: 1, kind: input, shape index: {}]   ;;  %s854_s2 = inlined_call_operand.hbm [shape: bf16[128,128], index: 2, kind: input, shape index: {}]   ;;  %s855_s3 = inlined_call_operand.hbm [shape: bf16[128,128], index: 3, kind: input, shape index: {}]   ;;  %s856_s4 = inlined_call_operand.vmem [shape: f32[8,128], index: 4, kind: input, shape index: {}]   ;;  %s857_s5 = inlined_call_operand.vmem [shape: f32[1,128], index: 5, kind: input, shape index: {}]   ;;  %s858_s6 = inlined_call_operand.hbm [shape: f32[8,128], index: 6, kind: output, shape index: {}]  }
   0x1   :  { %12 = vsyncpa [#allocation6], 0 }
   0x2   :  { %13 = vsyncpa [#allocation9], 0 }
   0x3   :  { %14 = vsyncpa [#allocation4], 0  ;;  %s700_s21 = smov [#allocation5]   ;;  %s582_s25 = scalar_lea.hbm %s853_s1, 1024 }
   0x4   :  { %s30_s22 = sshll.u32 %s700_s21, 4  ;;  %p583_p0 = scmp.ne.s32.totalorder %s853_s1, %s582_s25  ;;  %s31_s22 = int_to_ptr.vmem [resolvable:$true] %s30_s22 }
   0x5   :  { %p586_p1 = scmp.lt.u32.totalorder %s582_s25, %s853_s1 }
   0x7   :  { %p588_p2 = pnand %p586_p1, %p583_p0 }
   0x9   :  { %591 = shalt.err (!%p588_p2)
}
   0xa   :  { %s592_s30 = scalar_lea.vmem %s31_s22, 1024  ;;  %p597_p4 = scmp.lt.s32.totalorder %s31_s22, %s31_s22 }
   0xb   :  { %p593_p3 = scmp.ne.s32.totalorder %s31_s22, %s592_s30  ;;  %p598_p5 = scmp.lt.s32.totalorder %s592_s30, %s592_s30 }
   0xd   :  { %p599_p6 = por %p598_p5, %p597_p4 }
   0xf   :  { %p600_p7 = pnand %p599_p6, %p593_p3 }
  0x11   :  { %603 = shalt.err (!%p600_p7)
}
  0x12   :  { %s701_s7 = smov 64   ;;  %s702_s8 = smov 4  }
  0x13   :  { %36 = dma.hbm_to_vmem [thread:$0]  %s853_s1, 1024, %s31_s22, [#allocation6], %s701_s7, %s701_s7, %s702_s8  }
  0x14   :  { %s703_s11 = smov [#allocation2]   ;;  %s704_s13 = smov [#allocation7]  }
  0x15   :  { %s21_s12 = sshll.u32 %s703_s11, 4  ;;  %s42_s14 = sshll.u32 %s704_s13, 4  ;;  %s22_s12 = int_to_ptr.vmem [resolvable:$true] %s21_s12  ;;  %s43_s14 = int_to_ptr.vmem [resolvable:$true] %s42_s14 }
  0x16   :  { %s604_s17 = scalar_lea.hbm %s852_s0, 128 }
  0x17   :  { %p605_p8 = scmp.ne.s32.totalorder %s852_s0, %s604_s17  ;;  %p608_p9 = scmp.lt.u32.totalorder %s604_s17, %s852_s0 }
  0x19   :  { %p610_p10 = pnand %p608_p9, %p605_p8 }
  0x1b   :  { %613 = shalt.err (!%p610_p10)
}
  0x1c   :  { %s614_s1 = scalar_lea.vmem %s22_s12, 128  ;;  %p619_p12 = scmp.lt.s32.totalorder %s22_s12, %s22_s12 }
  0x1d   :  { %p615_p11 = scmp.ne.s32.totalorder %s22_s12, %s614_s1  ;;  %p620_p13 = scmp.lt.s32.totalorder %s614_s1, %s614_s1 }
  0x1f   :  { %p621_p0 = por %p620_p13, %p619_p12 }
  0x21   :  { %p622_p1 = pnand %p621_p0, %p615_p11 }
  0x23   :  { %625 = shalt.err (!%p622_p1)
}
  0x24   :  { %24 = dma.hbm_to_vmem [thread:$0]  %s852_s0, 128, %s22_s12, [#allocation3]  }
  0x25   :  { %s626_s26 = scalar_lea.hbm %s854_s2, 1024 }
  0x26   :  { %p627_p2 = scmp.ne.s32.totalorder %s854_s2, %s626_s26  ;;  %p630_p3 = scmp.lt.u32.totalorder %s626_s26, %s854_s2 }
  0x28   :  { %p632_p4 = pnand %p630_p3, %p627_p2 }
  0x2a   :  { %635 = shalt.err (!%p632_p4)
}
  0x2b   :  { %s636_s9 = scalar_lea.vmem %s43_s14, 1024  ;;  %p641_p6 = scmp.lt.s32.totalorder %s43_s14, %s43_s14 }
  0x2c   :  { %p637_p5 = scmp.ne.s32.totalorder %s43_s14, %s636_s9  ;;  %p642_p7 = scmp.lt.s32.totalorder %s636_s9, %s636_s9 }
  0x2e   :  { %p643_p8 = por %p642_p7, %p641_p6 }
  0x30   :  { %p644_p9 = pnand %p643_p8, %p637_p5 }
  0x32   :  { %647 = shalt.err (!%p644_p9)
}
  0x33   :  { %48 = dma.hbm_to_vmem [thread:$0]  %s854_s2, 1024, %s43_s14, [#allocation6], %s701_s7, %s701_s7, %s702_s8  }
  0x34   :  { %s705_s11 = smov [#allocation8]   ;;  %s648_s16 = scalar_lea.hbm %s855_s3, 1024 }
  0x35   :  { %s54_s12 = sshll.u32 %s705_s11, 4  ;;  %p649_p10 = scmp.ne.s32.totalorder %s855_s3, %s648_s16  ;;  %s55_s12 = int_to_ptr.vmem [resolvable:$true] %s54_s12 }
  0x36   :  { %p652_p11 = scmp.lt.u32.totalorder %s648_s16, %s855_s3 }
  0x38   :  { %p654_p12 = pnand %p652_p11, %p649_p10 }
  0x3a   :  { %657 = shalt.err (!%p654_p12)
}
  0x3b   :  { %s658_s21 = scalar_lea.vmem %s55_s12, 1024  ;;  %p663_p0 = scmp.lt.s32.totalorder %s55_s12, %s55_s12 }
  0x3c   :  { %p659_p13 = scmp.ne.s32.totalorder %s55_s12, %s658_s21  ;;  %p664_p1 = scmp.lt.s32.totalorder %s658_s21, %s658_s21 }
  0x3e   :  { %p665_p2 = por %p664_p1, %p663_p0 }
  0x40   :  { %p666_p3 = pnand %p665_p2, %p659_p13 }
  0x42   :  { %669 = shalt.err (!%p666_p3)
}
  0x43   :  { %60 = dma.hbm_to_vmem [thread:$0]  %s855_s3, 1024, %s55_s12, [#allocation9], %s701_s7, %s701_s7, %s702_s8  }
  0x44   :  { %692 = dma.done.wait [#allocation3], 128  }
  0x45   :  { %693 = vsyncadd [#allocation3], 4294967168 }
  0x46   :  { %694 = dma.done.wait [#allocation6], 2048  }
  0x47   :  { %695 = vsyncadd [#allocation6], 4294965248 }
  0x48   :  { %696 = dma.done.wait [#allocation9], 1024  }
  0x49   :  { %697 = vsyncadd [#allocation9], 4294966272  ;;  %v706_v0 = vmov 0.0   ;;  %vm707_vm0 = vmmov 0   ;;  %v558_v1 = vld [vmem:[#allocation5] sm:$0xff]   ;;  %v559_v2 = vld [vmem:[#allocation5 + $0x8] sm:$0xff]  }
  0x4a   :  { %489 = vmatprep.subr.bf16.mxu0 %v706_v0  ;;  %505 = vmatprep.mubr.msk.bf16.mxu0 %vm707_vm0, %v706_v0  ;;  %v560_v3 = vld [vmem:[#allocation5 + $0x10] sm:$0xff]   ;;  %v566_v4 = vld [vmem:[#allocation7] sm:$0xff]   ;;  %v561_v5 = vld [vmem:[#allocation5 + $0x18] sm:$0xff]   ;;  %s708_s24 = smov [#allocation10]  }
  0x4b   :  { %509 = vmatprep.subr.bf16.mxu1 %v706_v0  ;;  %525 = vmatprep.mubr.msk.bf16.mxu1 %vm707_vm0, %v706_v0  ;;  %v567_v6 = vld [vmem:[#allocation7 + $0x8] sm:$0xff]   ;;  %v562_v7 = vld [vmem:[#allocation5 + $0x20] sm:$0xff]   ;;  %v568_v8 = vld [vmem:[#allocation7 + $0x10] sm:$0xff]   ;;  %s424_s25 = sshll.u32 %s708_s24, 4  ;;  %s425_s25 = int_to_ptr.vmem [resolvable:$true] %s424_s25 }
  0x4c   :  { %490 = vmatpush3.bf16.msra.mxu0 %v558_v1  ;;  %510 = vmatpush3.bf16.msra.mxu1 %v566_v4  ;;  %v563_v9 = vld [vmem:[#allocation5 + $0x28] sm:$0xff]   ;;  %v569_v10 = vld [vmem:[#allocation7 + $0x18] sm:$0xff]   ;;  %v564_v11 = vld [vmem:[#allocation5 + $0x30] sm:$0xff]   ;;  %p675_p5 = scmp.lt.s32.totalorder %s425_s25, %s425_s25 }
  0x4d   :  { %491 = vmatprep.subr.bf16.mxu0 %v706_v0  ;;  %511 = vmatprep.subr.bf16.mxu1 %v706_v0  ;;  %v570_v12 = vld [vmem:[#allocation7 + $0x20] sm:$0xff]   ;;  %v565_v13 = vld [vmem:[#allocation5 + $0x38] sm:$0xff]   ;;  %v571_v15 = vld [vmem:[#allocation7 + $0x28] sm:$0xff]  }
  0x4e   :  { %v80_v14 = vld [vmem:[#allocation2] sm:$0xff]  ;;  %v572_v17 = vld [vmem:[#allocation7 + $0x30] sm:$0xff]   ;;  %v574_v19 = vld [vmem:[#allocation8] sm:$0xff]  }
  0x4f   :  { %v97_v16 = vpack.c.bf16 %v80_v14, %v80_v14  ;;  %v573_v18 = vld [vmem:[#allocation7 + $0x38] sm:$0xff]   ;;  %v575_v20 = vld [vmem:[#allocation8 + $0x8] sm:$0xff]   ;;  %v576_v21 = vld [vmem:[#allocation8 + $0x10] sm:$0xff]  }
  0x50   :  { %492 = vmatpush3.bf16.msra.mxu0 %v559_v2  ;;  %512 = vmatpush3.bf16.msra.mxu1 %v567_v6  ;;  %v577_v22 = vld [vmem:[#allocation8 + $0x18] sm:$0xff]   ;;  %v578_v23 = vld [vmem:[#allocation8 + $0x20] sm:$0xff]   ;;  %v579_v24 = vld [vmem:[#allocation8 + $0x28] sm:$0xff]  }
  0x51   :  { %493 = vmatprep.subr.bf16.mxu0 %v706_v0  ;;  %513 = vmatprep.subr.bf16.mxu1 %v706_v0  ;;  %v435_v25 = vld [vmem:[%s856_s4] ss:$0 sm:$0xff]  ;;  %v580_v34 = vld [vmem:[#allocation8 + $0x30] sm:$0xff]   ;;  %v444_v36 = vld [vmem:[%s856_s4 + $0x1] ss:$0 sm:$0xff]  ;;  %s670_s4 = scalar_lea.vmem %s425_s25, 128 }
  0x52   :  { %v581_v35 = vld [vmem:[#allocation8 + $0x38] sm:$0xff]   ;;  %p671_p4 = scmp.ne.s32.totalorder %s425_s25, %s670_s4  ;;  %p676_p6 = scmp.lt.s32.totalorder %s670_s4, %s670_s4 }
  0x53   :  { %v453_v45 = vld [vmem:[%s857_s5] ss:$0 sm:$0xff] }
  0x54   :  { %494 = vmatpush3.bf16.msra.mxu0 %v560_v3  ;;  %514 = vmatpush3.bf16.msra.mxu1 %v568_v8  ;;  %p677_p7 = por %p676_p6, %p675_p5 }
  0x55   :  { %495 = vmatprep.subr.bf16.mxu0 %v706_v0  ;;  %515 = vmatprep.subr.bf16.mxu1 %v706_v0 }
  0x56   :  { %p678_p8 = pnand %p677_p7, %p671_p4 }
  0x58   :  { %496 = vmatpush3.bf16.msra.mxu0 %v561_v5  ;;  %516 = vmatpush3.bf16.msra.mxu1 %v569_v10 }
  0x59   :  { %497 = vmatprep.subr.bf16.mxu0 %v706_v0  ;;  %517 = vmatprep.subr.bf16.mxu1 %v706_v0 }
  0x5c   :  { %498 = vmatpush3.bf16.msra.mxu0 %v562_v7  ;;  %518 = vmatpush3.bf16.msra.mxu1 %v570_v12 }
  0x5d   :  { %499 = vmatprep.subr.bf16.mxu0 %v706_v0  ;;  %519 = vmatprep.subr.bf16.mxu1 %v706_v0 }
  0x60   :  { %500 = vmatpush3.bf16.msra.mxu0 %v563_v9  ;;  %520 = vmatpush3.bf16.msra.mxu1 %v571_v15 }
  0x61   :  { %501 = vmatprep.subr.bf16.mxu0 %v706_v0  ;;  %521 = vmatprep.subr.bf16.mxu1 %v706_v0 }
  0x64   :  { %502 = vmatpush3.bf16.msra.mxu0 %v564_v11  ;;  %522 = vmatpush3.bf16.msra.mxu1 %v572_v17 }
  0x65   :  { %503 = vmatprep.subr.bf16.mxu0 %v706_v0  ;;  %523 = vmatprep.subr.bf16.mxu1 %v706_v0 }
  0x68   :  { %504 = vmatpush3.bf16.msra.mxu0 %v565_v13  ;;  %524 = vmatpush3.bf16.msra.mxu1 %v573_v18 }
  0x69   :  { %529 = vmatprep.subr.bf16.mxu0 %v706_v0 }
  0x6b   :  { %506 = vmatmul.mubr.bf16.vlgmr.msra.gmra.mrb[0].mxu0 %v97_v16 }
  0x6c   :  { %545 = vmatprep.mubr.msk.bf16.mxu0 %vm707_vm0, %v706_v0  ;;  %530 = vmatpush3.bf16.msra.mxu0 %v574_v19 }
  0x6d   :  { %531 = vmatprep.subr.bf16.mxu0 %v706_v0 }
  0x70   :  { %532 = vmatpush3.bf16.msra.mxu0 %v575_v20 }
  0x71   :  { %533 = vmatprep.subr.bf16.mxu0 %v706_v0 }
  0x74   :  { %534 = vmatpush3.bf16.msra.mxu0 %v576_v21 }
  0x75   :  { %535 = vmatprep.subr.bf16.mxu0 %v706_v0 }
  0x78   :  { %536 = vmatpush3.bf16.msra.mxu0 %v577_v22 }
  0x79   :  { %537 = vmatprep.subr.bf16.mxu0 %v706_v0 }
  0x7c   :  { %538 = vmatpush3.bf16.msra.mxu0 %v578_v23 }
  0x7d   :  { %539 = vmatprep.subr.bf16.mxu0 %v706_v0 }
  0x80   :  { %540 = vmatpush3.bf16.msra.mxu0 %v579_v24 }
  0x81   :  { %541 = vmatprep.subr.bf16.mxu0 %v706_v0 }
  0x84   :  { %542 = vmatpush3.bf16.msra.mxu0 %v580_v34 }
  0x85   :  { %543 = vmatprep.subr.bf16.mxu0 %v706_v0 }
  0x88   :  { %544 = vmatpush3.bf16.msra.mxu0 %v581_v35 }
 0x13e   :  { %v184_v26 = vpop.f32.mrb[0].mxu0 }
 0x13f   :  { %v185_v27 = vadd.f32 %v435_v25, %v184_v26  ;;  %v507_v28 = vpop.f32.mrb[1].mxu0 }
 0x140   :  { %v187_v29 = vpop.f32.mrb[2].mxu0 }
 0x141   :  { %vm190_vm1 = vcmp.gt.f32.partialorder %v185_v27, 0.0  ;;  %v191_v30 = vmul.f32 0.01, %v185_v27  ;;  %v508_v31 = vpop.f32.mrb[3].mxu0 }
 0x143   :  { %v192_v32 = vsel %vm190_vm1, %v185_v27, %v191_v30 }
 0x144   :  { %v209_v33 = vpack.c.bf16 %v192_v32, %v192_v32 }
 0x146   :  { %526 = vmatmul.mubr.bf16.vlgmr.msra.gmra.mrb[0].mxu1 %v209_v33 }
 0x219   :  { %v296_v37 = vpop.f32.mrb[0].mxu1 }
 0x21a   :  { %v297_v38 = vadd.f32 %v444_v36, %v296_v37  ;;  %v527_v39 = vpop.f32.mrb[1].mxu1 }
 0x21b   :  { %v299_v40 = vpop.f32.mrb[2].mxu1 }
 0x21c   :  { %vm302_vm2 = vcmp.gt.f32.partialorder %v297_v38, 0.0  ;;  %v303_v41 = vmul.f32 0.01, %v297_v38  ;;  %v528_v42 = vpop.f32.mrb[3].mxu1 }
 0x21e   :  { %v304_v43 = vsel %vm302_vm2, %v297_v38, %v303_v41 }
 0x21f   :  { %v321_v44 = vpack.c.bf16 %v304_v43, %v304_v43 }
 0x221   :  { %546 = vmatmul.mubr.bf16.vlgmr.msra.gmra.mrb[4].mxu0 %v321_v44 }
 0x2f4   :  { %v411_v46 = vpop.f32.mrb[4].mxu0 }
 0x2f5   :  { %v412_v47 = vadd.f32 %v453_v45, %v411_v46  ;;  %v547_v48 = vpop.f32.mrb[5].mxu0 }
 0x2f6   :  { %v414_v49 = vpop.f32.mrb[6].mxu0 }
 0x2f7   :  { %417 = vst [vmem:[#allocation10] sm:$0xff] %v412_v47  ;;  %v548_v50 = vpop.f32.mrb[7].mxu0 }
 0x2f8   :  { %681 = shalt.err (!%p678_p8)
}
 0x2f9   :  { %s682_s5 = scalar_lea.hbm %s858_s6, 128 }
 0x2fa   :  { %p683_p9 = scmp.ne.s32.totalorder %s858_s6, %s682_s5  ;;  %p686_p10 = scmp.lt.u32.totalorder %s682_s5, %s858_s6 }
 0x2fc   :  { %p688_p11 = pnand %p686_p10, %p683_p9 }
 0x2fe   :  { %691 = shalt.err (!%p688_p11)
}
 0x2ff   :  { %427 = dma.vmem_to_hbm [thread:$0]  %s425_s25, 128, %s858_s6, [#allocation4]  }
 0x300   :  { %698 = dma.done.wait [#allocation4], 128  }
 0x301   :  { %699 = vsyncadd [#allocation4], 4294967168 }
 0x302   :  { %431 = vsyncpa [#allocation3], 1 }
 0x303   :  { %432 = vsyncpa [#allocation6], 1 }
 0x304   :  { %433 = vsyncpa [#allocation9], 1 }
 0x305   :  { %434 = vsyncpa [#allocation4], 1 }

</bundles_post_ra>
